<compile_context>
chip_gen: v6e
topology: v6e:2x2x1
jax: 0.10.0
libtpu: 0.0.40
codegen_flags: <defaults>
</compile_context>

<pallas_src>
import functools

import jax
import jax.numpy as jnp
from jax import lax
from jax.experimental import pallas as pl
from jax.experimental.pallas import tpu as pltpu


def _round_up(n: int, m: int) -> int:
    return (n + m - 1) // m * m


# ---------------------------------------------------------------------------
# Kernels
# ---------------------------------------------------------------------------

def _embed_linear_vmem_kernel(idx_ref, tab_ref, w_ref, b_ref, out_ref, emb_ref,
                              *, tile_n):
    """Table VMEM-resident: in-kernel gather via dynamic row reads, one matmul/tile.

    idx_ref : (N_pad,) int32, SMEM (scalar prefetch)
    tab_ref : (V_pad, E_pad) f32, VMEM-resident (constant block index)
    w_ref   : (E_pad, O_pad) bf16, VMEM-resident
    b_ref   : (1, O_pad) f32, VMEM-resident
    out_ref : (TILE_N, O_pad) f32 output tile
    emb_ref : (TILE_N, E_pad) f32 VMEM scratch (gathered tile)
    """
    t = pl.program_id(0)
    base = t * tile_n

    def gather_one(r):
        tok = idx_ref[base + r]                              # scalar read (SMEM)
        emb_ref[pl.ds(r, 1), :] = tab_ref[pl.ds(tok, 1), :]  # dynamic row copy

    if tile_n <= 32:                      # short tiles: unroll at trace time
        for r in range(tile_n):
            gather_one(r)
    else:
        def body(r, carry):
            gather_one(r)
            return carry
        lax.fori_loop(0, tile_n, body, 0)

    acc = jnp.dot(emb_ref[...].astype(jnp.bfloat16), w_ref[...],
                  preferred_element_type=jnp.float32)
    out_ref[...] = acc + b_ref[...]


def _embed_linear_hbm_kernel(idx_ref, tab_hbm, w_ref, b_ref, out_ref, emb_ref,
                             sem, *, tile_n):
    """Table in HBM (pl.ANY): manual DMA gather with all row copies in flight.

    Used when the embedding table is too large to keep resident in VMEM.
    """
    t = pl.program_id(0)
    base = t * tile_n

    def start_one(r):
        tok = idx_ref[base + r]
        pltpu.make_async_copy(tab_hbm.at[tok], emb_ref.at[r], sem).start()

    def wait_one(_r):
        # All rows have the same size; each wait retires one row's bytes.
        pltpu.make_async_copy(tab_hbm.at[0], emb_ref.at[0], sem).wait()

    if tile_n <= 32:
        for r in range(tile_n):
            start_one(r)
        for r in range(tile_n):
            wait_one(r)
    else:
        def start_body(r, carry):
            start_one(r)
            return carry

        def wait_body(r, carry):
            wait_one(r)
            return carry

        lax.fori_loop(0, tile_n, start_body, 0)
        lax.fori_loop(0, tile_n, wait_body, 0)

    acc = jnp.dot(emb_ref[...].astype(jnp.bfloat16), w_ref[...],
                  preferred_element_type=jnp.float32)
    out_ref[...] = acc + b_ref[...]


# ---------------------------------------------------------------------------
# Wrapper
# ---------------------------------------------------------------------------

def embeding_transformer(x, table, weight_t, bias, *,
                         vmem_table_budget_bytes=16 << 20):
    """x: (B, S) int; table: (V, E); weight_t: (E, O); bias: (O,). -> (B, S, O) f32."""
    B, S = x.shape
    V, E = table.shape
    O = weight_t.shape[1]
    N = B * S

    # Lane-dense padding for MXU operands and output stores (perf review).
    E_pad = _round_up(max(E, 128), 128)
    O_pad = _round_up(max(O, 128), 128)
    V_pad = _round_up(V, 8)

    # Token-tile size: 256 fills the v6e/v7x 256x256 MXU; shrink for toy N.
    # (Use 128 when tuning specifically for v5e's 4x128x128 MXU.)
    TILE_N = 256 if N >= 256 else _round_up(N, 8)
    N_pad = _round_up(N, TILE_N)
    n_tiles = N_pad // TILE_N

    # Flatten + clip indices.  NOTE: PyTorch nn.Embedding raises on OOB
    # indices; we clamp so the gather can never read out of bounds.
    idx = jnp.clip(x.reshape(-1).astype(jnp.int32), 0, V - 1)
    if N_pad != N:
        idx = jnp.concatenate([idx, jnp.zeros((N_pad - N,), jnp.int32)])

    # Gather stays f32 (sublane-aligned dynamic rows); matmul runs in bf16
    # inside the kernel (weight pre-cast here), accumulating in f32.
    tab = jnp.zeros((V_pad, E_pad), jnp.float32).at[:V, :E].set(
        table.astype(jnp.float32))
    w = jnp.zeros((E_pad, O_pad), jnp.bfloat16).at[:E, :O].set(
        weight_t.astype(jnp.bfloat16))
    b2 = jnp.zeros((1, O_pad), jnp.float32).at[0, :O].set(
        bias.astype(jnp.float32))

    # Strategy: keep the table VMEM-resident (no per-row DMAs) when it fits the
    # budget (constant-index blocks are still double-buffered -> 2x); otherwise
    # leave it in HBM and gather rows with manual async copies.
    use_vmem_table = (2 * V_pad * E_pad * 4) <= vmem_table_budget_bytes

    scratch = [pltpu.VMEM((TILE_N, E_pad), jnp.float32)]
    if use_vmem_table:
        kernel = functools.partial(_embed_linear_vmem_kernel, tile_n=TILE_N)
        table_spec = pl.BlockSpec((V_pad, E_pad), lambda t, idx_ref: (0, 0))
    else:
        kernel = functools.partial(_embed_linear_hbm_kernel, tile_n=TILE_N)
        table_spec = pl.BlockSpec(memory_space=pl.ANY)
        scratch = scratch + [pltpu.SemaphoreType.DMA(())]

    grid_spec = pltpu.PrefetchScalarGridSpec(
        num_scalar_prefetch=1,               # idx -> SMEM, read by the kernel
        grid=(n_tiles,),
        in_specs=[
            table_spec,
            pl.BlockSpec((E_pad, O_pad), lambda t, idx_ref: (0, 0)),  # weight, resident
            pl.BlockSpec((1, O_pad), lambda t, idx_ref: (0, 0)),      # bias, resident
        ],
        out_specs=pl.BlockSpec((TILE_N, O_pad), lambda t, idx_ref: (t, 0)),
        scratch_shapes=scratch,
    )

    out = pl.pallas_call(
        kernel,
        out_shape=jax.ShapeDtypeStruct((N_pad, O_pad), jnp.float32),
        grid_spec=grid_spec,
        compiler_params=pltpu.CompilerParams(
            # Token tiles are independent -> megacore-shardable (v7x 2 TCs).
            dimension_semantics=("parallel",)),
    )(idx, tab, w, b2)

    return out[:N, :O].reshape(B, S, O)


# ---------------------------------------------------------------------------
# Self-test
# ---------------------------------------------------------------------------

if __name__ == "__main__":
    input_size = 32   # vocabulary size V
    embed_size = 32   # E
    output_size = 16  # O
    B, S = 2, 8       # batch, sequence length

    key = jax.random.PRNGKey(0)
    k_idx, k_tab, k_w, k_b = jax.random.split(key, 4)

    # Deterministic parameters (shapes from nn.Embedding / nn.Linear).
    table = jax.random.normal(k_tab, (input_size, embed_size), dtype=jnp.float32)
    # PyTorch nn.Linear.weight is (O, E); the kernel takes it transposed (E, O).
    w_oe = jax.random.normal(k_w, (output_size, embed_size), dtype=jnp.float32) * 0.1
    weight_t = w_oe.T
    bias = jax.random.normal(k_b, (output_size,), dtype=jnp.float32) * 0.1

    x = jax.random.randint(k_idx, (B, S), 0, input_size, dtype=jnp.int32)

    y = embeding_transformer(x, table, weight_t, bias)
    y = jax.block_until_ready(y)

    # Plain-JAX f32 reference (embedding gather + linear).  Kernel matmul runs
    # in bf16 on the MXU with f32 accumulation -> loosened tolerance.
    ref = jnp.take(table, x, axis=0) @ weight_t + bias
    assert y.shape == (B, S, output_size)
    assert jnp.allclose(y, ref, atol=2e-2, rtol=2e-2), "mismatch vs reference"

    print("KERNEL_OK")
</pallas_src>

<mosaic_0001>
module attributes {stable_mosaic.version = 11 : i64} {
  func.func @_embed_linear_vmem_kernel(%arg0: i32, %arg1: memref<16xi32, #tpu.memory_space<smem>>, %arg2: memref<32x128xf32, #tpu.memory_space<vmem>>, %arg3: memref<128x128xbf16, #tpu.memory_space<vmem>>, %arg4: memref<1x128xf32, #tpu.memory_space<vmem>>, %arg5: memref<16x128xf32, #tpu.memory_space<vmem>>, %arg6: memref<16x128xf32, #tpu.memory_space<vmem>>) attributes {dimension_semantics = [#tpu.dimension_semantics<parallel>], iteration_bounds = array<i64: 1>, scalar_prefetch = 1 : i64, scratch_operands = 1 : i64, tpu.core_type = #tpu.core_type<tc>, window_params = [{pipeline_mode = #tpu.pipeline_mode<synchronous>, transform_indices = @transform_0, window_bounds = array<i64: 32, 128>}, {pipeline_mode = #tpu.pipeline_mode<synchronous>, transform_indices = @transform_1, window_bounds = array<i64: 128, 128>}, {pipeline_mode = #tpu.pipeline_mode<synchronous>, transform_indices = @transform_2, window_bounds = array<i64: 1, 128>}, {transform_indices = @transform_3, window_bounds = array<i64: 16, 128>}]} {
    %c16_i32 = arith.constant 16 : i32
    %0 = arith.muli %arg0, %c16_i32 : i32
    %c0_i32 = arith.constant 0 : i32
    %1 = arith.addi %0, %c0_i32 : i32
    %2 = arith.index_cast %1 : i32 to index
    %3 = memref.load %arg1[%2] : memref<16xi32, #tpu.memory_space<smem>>
    %4 = arith.index_cast %3 : i32 to index
    %c0 = arith.constant 0 : index
    %5 = vector.load %arg2[%4, %c0] : memref<32x128xf32, #tpu.memory_space<vmem>>, vector<1x128xf32>
    %c0_0 = arith.constant 0 : index
    %c0_1 = arith.constant 0 : index
    %6 = vector.load %arg6[%c0_0, %c0_1] : memref<16x128xf32, #tpu.memory_space<vmem>>, vector<1x128xf32>
    tpu.vector_store %arg6[%c0_0, %c0_1], %5 {strides = array<i32>} : memref<16x128xf32, #tpu.memory_space<vmem>>, vector<1x128xf32>,
    %c1_i32 = arith.constant 1 : i32
    %7 = arith.addi %0, %c1_i32 : i32
    %8 = arith.index_cast %7 : i32 to index
    %9 = memref.load %arg1[%8] : memref<16xi32, #tpu.memory_space<smem>>
    %10 = arith.index_cast %9 : i32 to index
    %c0_2 = arith.constant 0 : index
    %11 = vector.load %arg2[%10, %c0_2] : memref<32x128xf32, #tpu.memory_space<vmem>>, vector<1x128xf32>
    %c1 = arith.constant 1 : index
    %c0_3 = arith.constant 0 : index
    %12 = vector.load %arg6[%c1, %c0_3] : memref<16x128xf32, #tpu.memory_space<vmem>>, vector<1x128xf32>
    tpu.vector_store %arg6[%c1, %c0_3], %11 {strides = array<i32>} : memref<16x128xf32, #tpu.memory_space<vmem>>, vector<1x128xf32>,
    %c2_i32 = arith.constant 2 : i32
    %13 = arith.addi %0, %c2_i32 : i32
    %14 = arith.index_cast %13 : i32 to index
    %15 = memref.load %arg1[%14] : memref<16xi32, #tpu.memory_space<smem>>
    %16 = arith.index_cast %15 : i32 to index
    %c0_4 = arith.constant 0 : index
    %17 = vector.load %arg2[%16, %c0_4] : memref<32x128xf32, #tpu.memory_space<vmem>>, vector<1x128xf32>
    %c2 = arith.constant 2 : index
    %c0_5 = arith.constant 0 : index
    %18 = vector.load %arg6[%c2, %c0_5] : memref<16x128xf32, #tpu.memory_space<vmem>>, vector<1x128xf32>
    tpu.vector_store %arg6[%c2, %c0_5], %17 {strides = array<i32>} : memref<16x128xf32, #tpu.memory_space<vmem>>, vector<1x128xf32>,
    %c3_i32 = arith.constant 3 : i32
    %19 = arith.addi %0, %c3_i32 : i32
    %20 = arith.index_cast %19 : i32 to index
    %21 = memref.load %arg1[%20] : memref<16xi32, #tpu.memory_space<smem>>
    %22 = arith.index_cast %21 : i32 to index
    %c0_6 = arith.constant 0 : index
    %23 = vector.load %arg2[%22, %c0_6] : memref<32x128xf32, #tpu.memory_space<vmem>>, vector<1x128xf32>
    %c3 = arith.constant 3 : index
    %c0_7 = arith.constant 0 : index
    %24 = vector.load %arg6[%c3, %c0_7] : memref<16x128xf32, #tpu.memory_space<vmem>>, vector<1x128xf32>
    tpu.vector_store %arg6[%c3, %c0_7], %23 {strides = array<i32>} : memref<16x128xf32, #tpu.memory_space<vmem>>, vector<1x128xf32>,
    %c4_i32 = arith.constant 4 : i32
    %25 = arith.addi %0, %c4_i32 : i32
    %26 = arith.index_cast %25 : i32 to index
    %27 = memref.load %arg1[%26] : memref<16xi32, #tpu.memory_space<smem>>
    %28 = arith.index_cast %27 : i32 to index
    %c0_8 = arith.constant 0 : index
    %29 = vector.load %arg2[%28, %c0_8] : memref<32x128xf32, #tpu.memory_space<vmem>>, vector<1x128xf32>
    %c4 = arith.constant 4 : index
    %c0_9 = arith.constant 0 : index
    %30 = vector.load %arg6[%c4, %c0_9] : memref<16x128xf32, #tpu.memory_space<vmem>>, vector<1x128xf32>
    tpu.vector_store %arg6[%c4, %c0_9], %29 {strides = array<i32>} : memref<16x128xf32, #tpu.memory_space<vmem>>, vector<1x128xf32>,
    %c5_i32 = arith.constant 5 : i32
    %31 = arith.addi %0, %c5_i32 : i32
    %32 = arith.index_cast %31 : i32 to index
    %33 = memref.load %arg1[%32] : memref<16xi32, #tpu.memory_space<smem>>
    %34 = arith.index_cast %33 : i32 to index
    %c0_10 = arith.constant 0 : index
    %35 = vector.load %arg2[%34, %c0_10] : memref<32x128xf32, #tpu.memory_space<vmem>>, vector<1x128xf32>
    %c5 = arith.constant 5 : index
    %c0_11 = arith.constant 0 : index
    %36 = vector.load %arg6[%c5, %c0_11] : memref<16x128xf32, #tpu.memory_space<vmem>>, vector<1x128xf32>
    tpu.vector_store %arg6[%c5, %c0_11], %35 {strides = array<i32>} : memref<16x128xf32, #tpu.memory_space<vmem>>, vector<1x128xf32>,
    %c6_i32 = arith.constant 6 : i32
    %37 = arith.addi %0, %c6_i32 : i32
    %38 = arith.index_cast %37 : i32 to index
    %39 = memref.load %arg1[%38] : memref<16xi32, #tpu.memory_space<smem>>
    %40 = arith.index_cast %39 : i32 to index
    %c0_12 = arith.constant 0 : index
    %41 = vector.load %arg2[%40, %c0_12] : memref<32x128xf32, #tpu.memory_space<vmem>>, vector<1x128xf32>
    %c6 = arith.constant 6 : index
    %c0_13 = arith.constant 0 : index
    %42 = vector.load %arg6[%c6, %c0_13] : memref<16x128xf32, #tpu.memory_space<vmem>>, vector<1x128xf32>
    tpu.vector_store %arg6[%c6, %c0_13], %41 {strides = array<i32>} : memref<16x128xf32, #tpu.memory_space<vmem>>, vector<1x128xf32>,
    %c7_i32 = arith.constant 7 : i32
    %43 = arith.addi %0, %c7_i32 : i32
    %44 = arith.index_cast %43 : i32 to index
    %45 = memref.load %arg1[%44] : memref<16xi32, #tpu.memory_space<smem>>
    %46 = arith.index_cast %45 : i32 to index
    %c0_14 = arith.constant 0 : index
    %47 = vector.load %arg2[%46, %c0_14] : memref<32x128xf32, #tpu.memory_space<vmem>>, vector<1x128xf32>
    %c7 = arith.constant 7 : index
    %c0_15 = arith.constant 0 : index
    %48 = vector.load %arg6[%c7, %c0_15] : memref<16x128xf32, #tpu.memory_space<vmem>>, vector<1x128xf32>
    tpu.vector_store %arg6[%c7, %c0_15], %47 {strides = array<i32>} : memref<16x128xf32, #tpu.memory_space<vmem>>, vector<1x128xf32>,
    %c8_i32 = arith.constant 8 : i32
    %49 = arith.addi %0, %c8_i32 : i32
    %50 = arith.index_cast %49 : i32 to index
    %51 = memref.load %arg1[%50] : memref<16xi32, #tpu.memory_space<smem>>
    %52 = arith.index_cast %51 : i32 to index
    %c0_16 = arith.constant 0 : index
    %53 = vector.load %arg2[%52, %c0_16] : memref<32x128xf32, #tpu.memory_space<vmem>>, vector<1x128xf32>
    %c8 = arith.constant 8 : index
    %c0_17 = arith.constant 0 : index
    %54 = vector.load %arg6[%c8, %c0_17] : memref<16x128xf32, #tpu.memory_space<vmem>>, vector<1x128xf32>
    tpu.vector_store %arg6[%c8, %c0_17], %53 {strides = array<i32>} : memref<16x128xf32, #tpu.memory_space<vmem>>, vector<1x128xf32>,
    %c9_i32 = arith.constant 9 : i32
    %55 = arith.addi %0, %c9_i32 : i32
    %56 = arith.index_cast %55 : i32 to index
    %57 = memref.load %arg1[%56] : memref<16xi32, #tpu.memory_space<smem>>
    %58 = arith.index_cast %57 : i32 to index
    %c0_18 = arith.constant 0 : index
    %59 = vector.load %arg2[%58, %c0_18] : memref<32x128xf32, #tpu.memory_space<vmem>>, vector<1x128xf32>
    %c9 = arith.constant 9 : index
    %c0_19 = arith.constant 0 : index
    %60 = vector.load %arg6[%c9, %c0_19] : memref<16x128xf32, #tpu.memory_space<vmem>>, vector<1x128xf32>
    tpu.vector_store %arg6[%c9, %c0_19], %59 {strides = array<i32>} : memref<16x128xf32, #tpu.memory_space<vmem>>, vector<1x128xf32>,
    %c10_i32 = arith.constant 10 : i32
    %61 = arith.addi %0, %c10_i32 : i32
    %62 = arith.index_cast %61 : i32 to index
    %63 = memref.load %arg1[%62] : memref<16xi32, #tpu.memory_space<smem>>
    %64 = arith.index_cast %63 : i32 to index
    %c0_20 = arith.constant 0 : index
    %65 = vector.load %arg2[%64, %c0_20] : memref<32x128xf32, #tpu.memory_space<vmem>>, vector<1x128xf32>
    %c10 = arith.constant 10 : index
    %c0_21 = arith.constant 0 : index
    %66 = vector.load %arg6[%c10, %c0_21] : memref<16x128xf32, #tpu.memory_space<vmem>>, vector<1x128xf32>
    tpu.vector_store %arg6[%c10, %c0_21], %65 {strides = array<i32>} : memref<16x128xf32, #tpu.memory_space<vmem>>, vector<1x128xf32>,
    %c11_i32 = arith.constant 11 : i32
    %67 = arith.addi %0, %c11_i32 : i32
    %68 = arith.index_cast %67 : i32 to index
    %69 = memref.load %arg1[%68] : memref<16xi32, #tpu.memory_space<smem>>
    %70 = arith.index_cast %69 : i32 to index
    %c0_22 = arith.constant 0 : index
    %71 = vector.load %arg2[%70, %c0_22] : memref<32x128xf32, #tpu.memory_space<vmem>>, vector<1x128xf32>
    %c11 = arith.constant 11 : index
    %c0_23 = arith.constant 0 : index
    %72 = vector.load %arg6[%c11, %c0_23] : memref<16x128xf32, #tpu.memory_space<vmem>>, vector<1x128xf32>
    tpu.vector_store %arg6[%c11, %c0_23], %71 {strides = array<i32>} : memref<16x128xf32, #tpu.memory_space<vmem>>, vector<1x128xf32>,
    %c12_i32 = arith.constant 12 : i32
    %73 = arith.addi %0, %c12_i32 : i32
    %74 = arith.index_cast %73 : i32 to index
    %75 = memref.load %arg1[%74] : memref<16xi32, #tpu.memory_space<smem>>
    %76 = arith.index_cast %75 : i32 to index
    %c0_24 = arith.constant 0 : index
    %77 = vector.load %arg2[%76, %c0_24] : memref<32x128xf32, #tpu.memory_space<vmem>>, vector<1x128xf32>
    %c12 = arith.constant 12 : index
    %c0_25 = arith.constant 0 : index
    %78 = vector.load %arg6[%c12, %c0_25] : memref<16x128xf32, #tpu.memory_space<vmem>>, vector<1x128xf32>
    tpu.vector_store %arg6[%c12, %c0_25], %77 {strides = array<i32>} : memref<16x128xf32, #tpu.memory_space<vmem>>, vector<1x128xf32>,
    %c13_i32 = arith.constant 13 : i32
    %79 = arith.addi %0, %c13_i32 : i32
    %80 = arith.index_cast %79 : i32 to index
    %81 = memref.load %arg1[%80] : memref<16xi32, #tpu.memory_space<smem>>
    %82 = arith.index_cast %81 : i32 to index
    %c0_26 = arith.constant 0 : index
    %83 = vector.load %arg2[%82, %c0_26] : memref<32x128xf32, #tpu.memory_space<vmem>>, vector<1x128xf32>
    %c13 = arith.constant 13 : index
    %c0_27 = arith.constant 0 : index
    %84 = vector.load %arg6[%c13, %c0_27] : memref<16x128xf32, #tpu.memory_space<vmem>>, vector<1x128xf32>
    tpu.vector_store %arg6[%c13, %c0_27], %83 {strides = array<i32>} : memref<16x128xf32, #tpu.memory_space<vmem>>, vector<1x128xf32>,
    %c14_i32 = arith.constant 14 : i32
    %85 = arith.addi %0, %c14_i32 : i32
    %86 = arith.index_cast %85 : i32 to index
    %87 = memref.load %arg1[%86] : memref<16xi32, #tpu.memory_space<smem>>
    %88 = arith.index_cast %87 : i32 to index
    %c0_28 = arith.constant 0 : index
    %89 = vector.load %arg2[%88, %c0_28] : memref<32x128xf32, #tpu.memory_space<vmem>>, vector<1x128xf32>
    %c14 = arith.constant 14 : index
    %c0_29 = arith.constant 0 : index
    %90 = vector.load %arg6[%c14, %c0_29] : memref<16x128xf32, #tpu.memory_space<vmem>>, vector<1x128xf32>
    tpu.vector_store %arg6[%c14, %c0_29], %89 {strides = array<i32>} : memref<16x128xf32, #tpu.memory_space<vmem>>, vector<1x128xf32>,
    %c15_i32 = arith.constant 15 : i32
    %91 = arith.addi %0, %c15_i32 : i32
    %92 = arith.index_cast %91 : i32 to index
    %93 = memref.load %arg1[%92] : memref<16xi32, #tpu.memory_space<smem>>
    %94 = arith.index_cast %93 : i32 to index
    %c0_30 = arith.constant 0 : index
    %95 = vector.load %arg2[%94, %c0_30] : memref<32x128xf32, #tpu.memory_space<vmem>>, vector<1x128xf32>
    %c15 = arith.constant 15 : index
    %c0_31 = arith.constant 0 : index
    %96 = vector.load %arg6[%c15, %c0_31] : memref<16x128xf32, #tpu.memory_space<vmem>>, vector<1x128xf32>
    tpu.vector_store %arg6[%c15, %c0_31], %95 {strides = array<i32>} : memref<16x128xf32, #tpu.memory_space<vmem>>, vector<1x128xf32>,
    %c0_32 = arith.constant 0 : index
    %c0_33 = arith.constant 0 : index
    %97 = vector.load %arg6[%c0_32, %c0_33] : memref<16x128xf32, #tpu.memory_space<vmem>>, vector<16x128xf32>
    %98 = arith.truncf %97 : vector<16x128xf32> to vector<16x128xbf16>
    %c0_34 = arith.constant 0 : index
    %c0_35 = arith.constant 0 : index
    %99 = vector.load %arg3[%c0_34, %c0_35] : memref<128x128xbf16, #tpu.memory_space<vmem>>, vector<128x128xbf16>
    %cst = arith.constant dense<0.000000e+00> : vector<16x128xf32>
    %100 = tpu.matmul %98, %99, %cst {dimension_numbers = #tpu.dot_dimension_numbers<[1], [0], [0], [1], [0, 0, 1, 1], [], []>} : vector<16x128xbf16>, vector<128x128xbf16>, vector<16x128xf32> -> vector<16x128xf32>
    %c0_36 = arith.constant 0 : index
    %c0_37 = arith.constant 0 : index
    %101 = vector.load %arg4[%c0_36, %c0_37] : memref<1x128xf32, #tpu.memory_space<vmem>>, vector<1x128xf32>
    %102 = vector.broadcast %101 : vector<1x128xf32> to vector<16x128xf32>
    %103 = arith.addf %100, %102 : vector<16x128xf32>
    %c0_38 = arith.constant 0 : index
    %c0_39 = arith.constant 0 : index
    %104 = vector.load %arg5[%c0_38, %c0_39] : memref<16x128xf32, #tpu.memory_space<vmem>>, vector<16x128xf32>
    tpu.vector_store %arg5[%c0_38, %c0_39], %103 {strides = array<i32>} : memref<16x128xf32, #tpu.memory_space<vmem>>, vector<16x128xf32>,
    return
  }
  func.func @transform_0(%arg0: i32, %arg1: memref<16xi32, #tpu.memory_space<smem>>) -> (i32, i32) {
    %c0_i32 = arith.constant 0 : i32
    %c0_i32_0 = arith.constant 0 : i32
    %c0_i32_1 = arith.constant 0 : i32
    return %c0_i32, %c0_i32_0 : i32, i32
  }
  func.func @transform_1(%arg0: i32, %arg1: memref<16xi32, #tpu.memory_space<smem>>) -> (i32, i32) {
    %c0_i32 = arith.constant 0 : i32
    %c0_i32_0 = arith.constant 0 : i32
    %c0_i32_1 = arith.constant 0 : i32
    return %c0_i32, %c0_i32_0 : i32, i32
  }
  func.func @transform_2(%arg0: i32, %arg1: memref<16xi32, #tpu.memory_space<smem>>) -> (i32, i32) {
    %c0_i32 = arith.constant 0 : i32
    %c0_i32_0 = arith.constant 0 : i32
    %c0_i32_1 = arith.constant 0 : i32
    return %c0_i32, %c0_i32_0 : i32, i32
  }
  func.func @transform_3(%arg0: i32, %arg1: memref<16xi32, #tpu.memory_space<smem>>) -> (i32, i32) {
    %c0_i32 = arith.constant 0 : i32
    %c0_i32_0 = arith.constant 0 : i32
    return %arg0, %c0_i32 : i32, i32
  }
}

</mosaic_0001>

<bundles_post_ra>
// kernel: tpu_custom_call.1
= control target key start
LH: loop header
LB: loop body
LE: loop exit
PB: predicated region body
PF: predicated region fallthrough
CT: control target
= control target key end

     0   :  { %s427_s15 = smov [#allocation4]   ;;  %s498_s0 = inlined_call_operand.hbm [shape: s32[16], index: 0, kind: input, shape index: {}]   ;;  %s499_s1 = inlined_call_operand.hbm [shape: f32[32,128], index: 1, kind: input, shape index: {}]   ;;  %s500_s2 = inlined_call_operand.hbm [shape: bf16[128,128], index: 2, kind: input, shape index: {}]   ;;  %s501_s3 = inlined_call_operand.vmem [shape: f32[1,128], index: 3, kind: input, shape index: {}]   ;;  %s502_s4 = inlined_call_operand.hbm [shape: f32[16,128], index: 4, kind: output, shape index: {}]  }
   0x1   :  { %10 = dma.hbm_to_smem %s498_s0, 16, %s427_s15, [#allocation3] }
   0x2   :  { %419 = dma.done.wait [#allocation3], 16 }
   0x3   :  { %420 = vsyncadd [#allocation3], 4294967280 }
   0x4   :  { %12 = sfence }
   0x5   :  { %13 = vsyncpa [#allocation6], 0 }
   0x6   :  { %14 = vsyncpa [#allocation9], 0 }
   0x7   :  { %15 = vsyncpa [#allocation7], 0  ;;  %s428_s18 = smov [#allocation5]  }
   0x8   :  { %s21_s19 = sshll.u32 %s428_s18, 4  ;;  %s22_s19 = int_to_ptr.vmem [resolvable:$true] %s21_s19 }
   0x9   :  { %s367_s20 = scalar_lea.vmem %s22_s19, 512  ;;  %p372_p1 = scmp.lt.s32.totalorder %s22_s19, %s22_s19 }
   0xa   :  { %p368_p0 = scmp.ne.s32.totalorder %s22_s19, %s367_s20  ;;  %p373_p2 = scmp.lt.s32.totalorder %s367_s20, %s367_s20 }
   0xc   :  { %p374_p3 = por %p373_p2, %p372_p1 }
   0xe   :  { %p375_p4 = pnand %p374_p3, %p368_p0 }
  0x10   :  { %378 = shalt.err (!%p375_p4)
}
  0x11   :  { %s429_s21 = smov 128   ;;  %s430_s22 = smov 8  }
  0x12   :  { %27 = dma.hbm_to_vmem [thread:$0]  %s499_s1, 512, %s22_s19, [#allocation6], %s429_s21, %s429_s21, %s430_s22  }
  0x13   :  { %s431_s24 = smov [#allocation8]  }
  0x14   :  { %s33_s25 = sshll.u32 %s431_s24, 4  ;;  %s34_s25 = int_to_ptr.vmem [resolvable:$true] %s33_s25 }
  0x15   :  { %s387_s26 = scalar_lea.vmem %s34_s25, 1024  ;;  %p392_p6 = scmp.lt.s32.totalorder %s34_s25, %s34_s25 }
  0x16   :  { %p388_p5 = scmp.ne.s32.totalorder %s34_s25, %s387_s26  ;;  %p393_p7 = scmp.lt.s32.totalorder %s387_s26, %s387_s26 }
  0x18   :  { %p394_p8 = por %p393_p7, %p392_p6 }
  0x1a   :  { %p395_p9 = pnand %p394_p8, %p388_p5 }
  0x1c   :  { %398 = shalt.err (!%p395_p9)
}
  0x1d   :  { %s432_s27 = smov 64   ;;  %s433_s28 = smov 4  }
  0x1e   :  { %39 = dma.hbm_to_vmem [thread:$0]  %s500_s2, 1024, %s34_s25, [#allocation9], %s432_s27, %s432_s27, %s433_s28  }
  0x1f   :  { %421 = dma.done.wait [#allocation6], 512  }
  0x20   :  { %422 = vsyncadd [#allocation6], 4294966784 }
  0x21   :  { %423 = dma.done.wait [#allocation9], 1024  }
  0x22   :  { %424 = vsyncadd [#allocation9], 4294966272  ;;  %v434_v0 = vmov 0.0   ;;  %vm435_vm0 = vmmov 0   ;;  %s50_s1 = sld [smem:[#allocation4]]  ;;  %v343_v1 = vld [vmem:[#allocation8 + $0x38] sm:$0xff]  }
  0x23   :  { %313 = vmatprep.subr.bf16.mxu0 %v434_v0  ;;  %329 = vmatprep.mubr.msk.bf16.mxu0 %vm435_vm0, %v434_v0  ;;  %s280_s5 = sld [smem:[#allocation4 + $0x1]]  ;;  %v344_v2 = vld [vmem:[#allocation8 + $0x30] sm:$0xff]   ;;  %v345_v3 = vld [vmem:[#allocation8 + $0x28] sm:$0xff]   ;;  %v346_v10 = vld [vmem:[#allocation8 + $0x20] sm:$0xff]  }
  0x24   :  { %s281_s6 = sld [smem:[#allocation4 + $0x2]]  ;;  %314 = vmatpush3.bf16.msra.mxu0 %v343_v1  ;;  %v347_v11 = vld [vmem:[#allocation8 + $0x18] sm:$0xff]   ;;  %v348_v13 = vld [vmem:[#allocation8 + $0x10] sm:$0xff]   ;;  %v349_v18 = vld [vmem:[#allocation8 + $0x8] sm:$0xff]  }
  0x25   :  { %s282_s7 = sld [smem:[#allocation4 + $0x3]]  ;;  %315 = vmatprep.subr.bf16.mxu0 %v434_v0  ;;  %v350_v23 = vld [vmem:[#allocation8] sm:$0xff]   ;;  %v295_v28 = vld [vmem:[%s501_s3] ss:$0 sm:$0xff] }
  0x26   :  { %s283_s8 = sld [smem:[#allocation4 + $0x4]] }
  0x27   :  { %s284_s9 = sld [smem:[#allocation4 + $0x5]] }
  0x28   :  { %316 = vmatpush3.bf16.msra.mxu0 %v344_v2  ;;  %s51_s2 = scalar_lea.vmem [#allocation5], %s50_s1  ;;  %s285_s15 = sld [smem:[#allocation4 + $0x6]] }
  0x29   :  { %317 = vmatprep.subr.bf16.mxu0 %v434_v0  ;;  %v52_v4 = vld [vmem:[%s51_s2] sm:$0x1]  ;;  %s56_s10 = scalar_lea.vmem [#allocation5], %s280_s5  ;;  %s286_s16 = sld [smem:[#allocation4 + $0x7]] }
  0x2a   :  { %v57_v5 = vld [vmem:[%s56_s10] sm:$0x1]  ;;  %s61_s11 = scalar_lea.vmem [#allocation5], %s281_s6  ;;  %53 = vst [vmem:[#allocation2] sm:$0x1] %v52_v4  ;;  %s287_s17 = sld [smem:[#allocation4 + $0x8]] }
  0x2b   :  { %v62_v6 = vld [vmem:[%s61_s11] sm:$0x1]  ;;  %58 = vst [vmem:[#allocation2 + $0x1] sm:$0x1] %v57_v5  ;;  %s66_s12 = scalar_lea.vmem [#allocation5], %s282_s7  ;;  %s288_s18 = sld [smem:[#allocation4 + $0x9]] }
  0x2c   :  { %63 = vst [vmem:[#allocation2 + $0x2] sm:$0x1] %v62_v6  ;;  %v67_v7 = vld [vmem:[%s66_s12] sm:$0x1]  ;;  %s71_s13 = scalar_lea.vmem [#allocation5], %s283_s8  ;;  %318 = vmatpush3.bf16.msra.mxu0 %v345_v3  ;;  %s289_s19 = sld [smem:[#allocation4 + $0xa]] }
  0x2d   :  { %v72_v8 = vld [vmem:[%s71_s13] sm:$0x1]  ;;  %s76_s14 = scalar_lea.vmem [#allocation5], %s284_s9  ;;  %68 = vst [vmem:[#allocation2 + $0x3] sm:$0x1] %v67_v7  ;;  %319 = vmatprep.subr.bf16.mxu0 %v434_v0  ;;  %s290_s20 = sld [smem:[#allocation4 + $0xb]] }
  0x2e   :  { %v77_v9 = vld [vmem:[%s76_s14] sm:$0x1]  ;;  %73 = vst [vmem:[#allocation2 + $0x4] sm:$0x1] %v72_v8  ;;  %s480_s0 = sld [smem:[#allocation4 + $0xc]]  ;;  %s81_s23 = scalar_lea.vmem [#allocation5], %s285_s15 }
  0x2f   :  { %78 = vst [vmem:[#allocation2 + $0x5] sm:$0x1] %v77_v9  ;;  %v82_v12 = vld [vmem:[%s81_s23] sm:$0x1]  ;;  %s482_s24 = sld [smem:[#allocation4 + $0xd]]  ;;  %s86_s25 = scalar_lea.vmem [#allocation5], %s286_s16 }
  0x30   :  { %320 = vmatpush3.bf16.msra.mxu0 %v346_v10  ;;  %83 = vst [vmem:[#allocation2 + $0x6] sm:$0x1] %v82_v12  ;;  %v87_v14 = vld [vmem:[%s86_s25] sm:$0x1]  ;;  %s293_s26 = sld [smem:[#allocation4 + $0xe]]  ;;  %s91_s27 = scalar_lea.vmem [#allocation5], %s287_s17 }
  0x31   :  { %321 = vmatprep.subr.bf16.mxu0 %v434_v0  ;;  %88 = vst [vmem:[#allocation2 + $0x7] sm:$0x1] %v87_v14  ;;  %v92_v15 = vld [vmem:[%s91_s27] sm:$0x1]  ;;  %s294_s28 = sld [smem:[#allocation4 + $0xf]]  ;;  %s96_s29 = scalar_lea.vmem [#allocation5], %s288_s18 }
  0x32   :  { %93 = vst [vmem:[#allocation2 + $0x8] sm:$0x1] %v92_v15  ;;  %v97_v16 = vld [vmem:[%s96_s29] sm:$0x1]  ;;  %s101_s30 = scalar_lea.vmem [#allocation5], %s289_s19  ;;  %s436_s10 = smov [#allocation10]  }
  0x33   :  { %98 = vst [vmem:[#allocation2 + $0x9] sm:$0x1] %v97_v16  ;;  %v102_v17 = vld [vmem:[%s101_s30] sm:$0x1]  ;;  %s106_s1 = scalar_lea.vmem [#allocation5], %s290_s20  ;;  %s251_s11 = sshll.u32 %s436_s10, 4  ;;  %s252_s11 = int_to_ptr.vmem [resolvable:$true] %s251_s11 }
  0x34   :  { %322 = vmatpush3.bf16.msra.mxu0 %v347_v11  ;;  %103 = vst [vmem:[#allocation2 + $0xa] sm:$0x1] %v102_v17  ;;  %v107_v19 = vld [vmem:[%s106_s1] sm:$0x1]  ;;  %s111_s5 = scalar_lea.vmem [#allocation5], %s480_s0  ;;  %s399_s12 = scalar_lea.vmem %s252_s11, 256 }
  0x35   :  { %323 = vmatprep.subr.bf16.mxu0 %v434_v0  ;;  %108 = vst [vmem:[#allocation2 + $0xb] sm:$0x1] %v107_v19  ;;  %v112_v20 = vld [vmem:[%s111_s5] sm:$0x1]  ;;  %s116_s6 = scalar_lea.vmem [#allocation5], %s482_s24  ;;  %p400_p10 = scmp.ne.s32.totalorder %s252_s11, %s399_s12 }
  0x36   :  { %113 = vst [vmem:[#allocation2 + $0xc] sm:$0x1] %v112_v20  ;;  %v117_v21 = vld [vmem:[%s116_s6] sm:$0x1]  ;;  %s121_s7 = scalar_lea.vmem [#allocation5], %s293_s26  ;;  %p404_p11 = scmp.lt.s32.totalorder %s252_s11, %s252_s11 }
  0x37   :  { %118 = vst [vmem:[#allocation2 + $0xd] sm:$0x1] %v117_v21  ;;  %v122_v22 = vld [vmem:[%s121_s7] sm:$0x1]  ;;  %s126_s8 = scalar_lea.vmem [#allocation5], %s294_s28  ;;  %p405_p12 = scmp.lt.s32.totalorder %s399_s12, %s399_s12 }
  0x38   :  { %324 = vmatpush3.bf16.msra.mxu0 %v348_v13  ;;  %123 = vst [vmem:[#allocation2 + $0xe] sm:$0x1] %v122_v22  ;;  %v127_v24 = vld [vmem:[%s126_s8] sm:$0x1] }
  0x39   :  { %325 = vmatprep.subr.bf16.mxu0 %v434_v0  ;;  %128 = vst [vmem:[#allocation2 + $0xf] sm:$0x1] %v127_v24  ;;  %v129_v25 = vld [vmem:[#allocation2] sm:$0xff]  ;;  %p406_p13 = por %p405_p12, %p404_p11 }
  0x3b   :  { %p407_p0 = pnand %p406_p13, %p400_p10 }
  0x3c   :  { %326 = vmatpush3.bf16.msra.mxu0 %v349_v18 }
  0x3d   :  { %327 = vmatprep.subr.bf16.mxu0 %v434_v0 }
  0x40   :  { %328 = vmatpush3.bf16.msra.mxu0 %v350_v23  ;;  %v130_v26 = vld [vmem:[#allocation2 + $0x8] sm:$0xff] }
  0x41   :  { %v131_v27 = vpack.c.bf16 %v130_v26, %v129_v25 }
  0x43   :  { %330 = vmatmul.mubr.bf16.vlgmr.msra.gmra.mxu0 %v131_v27 }
 0x103   :  { %v237_v29 = vpop.f32.mrf.mxu0 }
 0x104   :  { %v238_v30 = vadd.f32 %v295_v28, %v237_v29 }
 0x105   :  { %v331_v31 = vpop.f32.mrf.mxu0 }
 0x106   :  { %244 = vst [vmem:[#allocation10] sm:$0xff] %v238_v30 }
 0x107   :  { %v240_v32 = vpop.f32.mrf.mxu0 }
 0x108   :  { %v241_v33 = vadd.f32 %v295_v28, %v240_v32 }
 0x109   :  { %v332_v34 = vpop.f32.mrf.mxu0 }
 0x10a   :  { %245 = vst [vmem:[#allocation10 + $0x8] sm:$0xff] %v241_v33 }
 0x10b   :  { %410 = shalt.err (!%p407_p0)
}
 0x10c   :  { %257 = dma.vmem_to_hbm [thread:$0]  %s252_s11, 256, %s502_s4, [#allocation7], %s429_s21, %s429_s21, %s430_s22  }
 0x10d   :  { %425 = dma.done.wait [#allocation7], 256  }
 0x10e   :  { %426 = vsyncadd [#allocation7], 4294967040 }
 0x10f   :  { %261 = vsyncpa [#allocation6], 1 }
 0x110   :  { %262 = vsyncpa [#allocation9], 1 }
 0x111   :  { %263 = vsyncpa [#allocation7], 1 }

</bundles_post_ra>
